<compile_context>
chip_gen: v7x
topology: tpu7x:2x2x1
jax: 0.10.0
libtpu: 0.0.40
codegen_flags: <defaults>
</compile_context>

<pallas_src>
import functools

import jax
import jax.numpy as jnp
from jax.experimental import pallas as pl
from jax.experimental.pallas import tpu as pltpu


_LANE = 128   # lane width: feature dims padded to multiples of this
_TK_CANDIDATES = (512, 384, 256, 128)
_TB_CANDIDATES = (512, 256, 128, 64, 32, 16, 8)


def _round_up(x, m):
    return ((x + m - 1) // m) * m


def _vmem_budget_bytes():
    """Per-generation VMEM budget with headroom.

    ~48 MiB on v7x (64 MiB physical per TC), up to 112 MiB on v5e/v6e (128 MiB).
    """
    phys = 64 * 2**20
    try:
        info = pltpu.get_tpu_info()
        phys = int(getattr(info, "vmem_capacity_bytes", phys))
    except Exception:
        pass
    return int(min(phys * 3 // 4, 112 * 2**20))


def _pad_d_in(d_in):
    """Padded input-feature size: lane aligned, minimal padding over K tiles."""
    d_lane = _round_up(d_in, _LANE)
    if d_lane <= max(_TK_CANDIDATES):
        return d_lane
    best = None
    for tk in _TK_CANDIDATES:  # iterate largest-first so ties prefer bigger tk
        cand = _round_up(d_in, tk)
        if best is None or cand < best:
            best = cand
    return best


def _pick_tk(d_pad):
    """Largest K tile in {512,384,256,128} dividing d_pad (d_pad itself if small)."""
    if d_pad <= max(_TK_CANDIDATES):
        return d_pad
    for tk in _TK_CANDIDATES:
        if d_pad % tk == 0:
            return tk
    return _LANE  # unreachable: d_pad is always a multiple of 128


def _batch_tiling(b, tb_max, allow_split):
    """Return (tile_rows, padded_batch)."""
    if b <= 8 or (b <= tb_max and not allow_split):
        return b, b                                # single full-extent block
    if allow_split and b <= 2 * tb_max:
        tb = _round_up(-(-b // 2), 8)              # 2 parallel tiles (megacore)
        return tb, 2 * tb
    tb = tb_max
    return tb, _round_up(b, tb)


def _mlp_vmem_need(tb, tk, h_pad, o_pad, x_bytes, w_bytes, nk):
    """Conservative VMEM estimate (assumes double buffers even for Buffered(1))."""
    return (2 * tb * tk * x_bytes                       # x tiles
            + (2 if nk > 1 else 1) * tk * h_pad * w_bytes   # w1 K-slices
            + 2 * h_pad * w_bytes                       # b1
            + 2 * h_pad * o_pad * w_bytes               # w2
            + 2 * o_pad * w_bytes                       # b2
            + 2 * tb * o_pad * 4                        # out tiles
            + tb * h_pad * 4)                           # f32 accumulator


def _linear_vmem_need(tb, tk, o_pad, x_bytes, w_bytes, nk):
    return (2 * tb * tk * x_bytes
            + (2 if nk > 1 else 1) * tk * o_pad * w_bytes
            + 2 * o_pad * w_bytes
            + 2 * tb * o_pad * 4)


def _pick_tb_max(need_fn, budget):
    for tb in _TB_CANDIDATES:
        if need_fn(tb) <= int(budget * 0.8):
            return tb
    return _TB_CANDIDATES[-1]


# -------------------------- Pallas kernels ---------------------------------


def _mlp2_kernel(x_ref, w1_ref, b1_ref, w2_ref, b2_ref, o_ref, acc_ref,
                 *, act, last_act):
    """(x @ W1 + b1) -> act -> (@ W2 + b2) [-> tanh * last_act], K-tiled layer 1."""
    k = pl.program_id(1)

    @pl.when(k == 0)
    def _():
        acc_ref[...] = jnp.zeros_like(acc_ref)

    # Feed the MXU in the weights' native (typically bf16) precision; f32 accumulate.
    acc_ref[...] += jnp.dot(
        x_ref[...].astype(w1_ref.dtype),
        w1_ref[...],
        preferred_element_type=jnp.float32,
    )

    @pl.when(k == pl.num_programs(1) - 1)
    def _():
        h = acc_ref[...] + b1_ref[...].astype(jnp.float32)   # b1 is zeros if nobias
        if act == "relu":
            h = jnp.maximum(h, 0.0)
        else:  # leaky_relu, torch default negative_slope = 0.01
            h = jnp.where(h >= 0.0, h, 0.01 * h)
        y = jnp.dot(h.astype(w2_ref.dtype), w2_ref[...],
                    preferred_element_type=jnp.float32)
        y = y + b2_ref[...].astype(jnp.float32)
        if last_act is not None:
            y = jnp.tanh(y) * jnp.float32(last_act)
        o_ref[...] = y.astype(o_ref.dtype)


def _linear_kernel(x_ref, w_ref, b_ref, o_ref):
    """Single Linear layer, K-tiled: accumulate x @ W into the resident output."""
    k = pl.program_id(1)

    @pl.when(k == 0)
    def _():
        o_ref[...] = jnp.zeros_like(o_ref)

    o_ref[...] += jnp.dot(x_ref[...].astype(w_ref.dtype), w_ref[...],
                          preferred_element_type=jnp.float32)

    @pl.when(k == pl.num_programs(1) - 1)
    def _():
        o_ref[...] += b_ref[...].astype(jnp.float32)


# -------------------------- host-side wrapper -------------------------------


def _pad_2d(x, rows, cols):
    B, D = x.shape
    if rows == B and cols == D:
        return x
    return jnp.zeros((rows, cols), x.dtype).at[:B, :D].set(x)


def fcn_forward(x, params, *, last_act=None, linear=False):
    """FCN forward pass with a single fused pallas_call.

    x      : (B, D) array, D = channel_in * height * width (any float dtype).
    params : dict from init_fcn_params (weights stored padded, (in, out) layout).
    Returns: (B, out_size) float32.
    """
    B, D = x.shape
    out_size = params["out_size"]
    budget = _vmem_budget_bytes()
    x_bytes = x.dtype.itemsize

    if linear and last_act is None:
        w, b = params["w"], params["b"]
        d_pad, o_pad = w.shape
        w_bytes = w.dtype.itemsize
        tk = _pick_tk(d_pad)
        nk = d_pad // tk
        tb_max = _pick_tb_max(
            lambda tb: _linear_vmem_need(tb, tk, o_pad, x_bytes, w_bytes, nk), budget)
        tb, b_pad = _batch_tiling(B, tb_max, allow_split=(nk == 1))
        nb = b_pad // tb
        xp = _pad_2d(x, b_pad, d_pad)

        need = _linear_vmem_need(tb, tk, o_pad, x_bytes, w_bytes, nk)
        vmem_limit = int(min(budget, max(2 * need, 16 * 2**20)))
        w_reads = nb if nk > 1 else 1
        cost = pl.CostEstimate(
            flops=2 * b_pad * d_pad * o_pad,
            transcendentals=0,
            bytes_accessed=int(xp.nbytes + w_reads * w.nbytes + b.nbytes
                               + b_pad * o_pad * 4),
        )

        y = pl.pallas_call(
            _linear_kernel,
            out_shape=jax.ShapeDtypeStruct((b_pad, o_pad), jnp.float32),
            grid_spec=pltpu.PrefetchScalarGridSpec(
                num_scalar_prefetch=0,
                grid=(nb, nk),
                in_specs=[
                    pl.BlockSpec((tb, tk), lambda i, k: (i, k)),        # x tile
                    pl.BlockSpec((tk, o_pad), lambda i, k: (k, 0)),     # w K-slice
                    pl.BlockSpec((1, o_pad), lambda i, k: (0, 0),       # bias (resident)
                                 pipeline_mode=pl.Buffered(1)),
                ],
                out_specs=pl.BlockSpec((tb, o_pad), lambda i, k: (i, 0)),
            ),
            compiler_params=pltpu.CompilerParams(
                dimension_semantics=("parallel", "arbitrary"),
                vmem_limit_bytes=vmem_limit,
            ),
            cost_estimate=cost,
        )(xp, w, b)
        return y[:B, :out_size]

    # ---- two-layer MLP path ----
    w1, b1, w2, b2 = params["w1"], params["b1"], params["w2"], params["b2"]
    d_pad, h_pad = w1.shape
    o_pad = w2.shape[1]
    w_bytes = w1.dtype.itemsize
    tk = _pick_tk(d_pad)
    nk = d_pad // tk
    tb_max = _pick_tb_max(
        lambda tb: _mlp_vmem_need(tb, tk, h_pad, o_pad, x_bytes, w_bytes, nk), budget)
    tb, b_pad = _batch_tiling(B, tb_max, allow_split=(nk == 1))
    nb = b_pad // tb
    xp = _pad_2d(x, b_pad, d_pad)

    act = "leaky_relu" if last_act is not None else "relu"
    kernel = functools.partial(_mlp2_kernel, act=act, last_act=last_act)

    need = _mlp_vmem_need(tb, tk, h_pad, o_pad, x_bytes, w_bytes, nk)
    vmem_limit = int(min(budget, max(2 * need, 16 * 2**20)))
    w1_reads = nb if nk > 1 else 1
    cost = pl.CostEstimate(
        flops=2 * b_pad * (d_pad * h_pad + h_pad * o_pad),
        transcendentals=(b_pad * o_pad) if last_act is not None else 0,
        bytes_accessed=int(xp.nbytes + w1_reads * w1.nbytes + b1.nbytes
                           + w2.nbytes + b2.nbytes + b_pad * o_pad * 4),
    )

    y = pl.pallas_call(
        kernel,
        out_shape=jax.ShapeDtypeStruct((b_pad, o_pad), jnp.float32),
        grid_spec=pltpu.PrefetchScalarGridSpec(
            num_scalar_prefetch=0,
            grid=(nb, nk),
            in_specs=[
                pl.BlockSpec((tb, tk), lambda i, k: (i, k)),            # x batch/K tile
                pl.BlockSpec((tk, h_pad), lambda i, k: (k, 0)),         # w1 K-slice
                pl.BlockSpec((1, h_pad), lambda i, k: (0, 0),           # b1 (resident)
                             pipeline_mode=pl.Buffered(1)),
                pl.BlockSpec((h_pad, o_pad), lambda i, k: (0, 0),       # w2 (resident)
                             pipeline_mode=pl.Buffered(1)),
                pl.BlockSpec((1, o_pad), lambda i, k: (0, 0),           # b2 (resident)
                             pipeline_mode=pl.Buffered(1)),
            ],
            out_specs=pl.BlockSpec((tb, o_pad), lambda i, k: (i, 0)),
            scratch_shapes=[pltpu.VMEM((tb, h_pad), jnp.float32)],
        ),
        compiler_params=pltpu.CompilerParams(
            dimension_semantics=("parallel", "arbitrary"),
            vmem_limit_bytes=vmem_limit,
        ),
        cost_estimate=cost,
    )(xp, w1, b1, w2, b2)
    return y[:B, :out_size]


# ------------------------------ params --------------------------------------


def init_fcn_params(key, channel_in, height, width, hidden_size, out_size,
                    *, last_act=None, linear=False, nobias=False,
                    param_dtype=jnp.bfloat16):
    """PyTorch nn.Linear-style init; weights stored (in, out), zero-padded to
    lane-aligned shapes so the kernel's blocks are lane-dense.  param_dtype
    defaults to bfloat16 so the MXU runs at its bf16 rate and W1 HBM traffic is
    halved; accumulation inside the kernel is always f32."""
    d_in = channel_in * height * width
    d_pad = _pad_d_in(d_in)
    o_pad = _round_up(out_size, _LANE)

    def make_linear(k, fan_in, fan_in_pad, fan_out, fan_out_pad, use_bias):
        kw, kb = jax.random.split(k)
        bound = 1.0 / (fan_in ** 0.5)
        w = jax.random.uniform(kw, (fan_in, fan_out), jnp.float32, -bound, bound)
        w_p = jnp.zeros((fan_in_pad, fan_out_pad), param_dtype)
        w_p = w_p.at[:fan_in, :fan_out].set(w.astype(param_dtype))
        if use_bias:
            b = jax.random.uniform(kb, (1, fan_out), jnp.float32, -bound, bound)
        else:
            b = jnp.zeros((1, fan_out), jnp.float32)
        b_p = jnp.zeros((1, fan_out_pad), param_dtype)
        b_p = b_p.at[:, :fan_out].set(b.astype(param_dtype))
        return w_p, b_p

    if linear and last_act is None:
        w, b = make_linear(key, d_in, d_pad, out_size, o_pad, True)
        return {"w": w, "b": b, "out_size": out_size, "d_in": d_in}

    h_pad = _round_up(hidden_size[0], _LANE)
    use_bias = True if last_act is not None else (not nobias)
    k1, k2 = jax.random.split(key)
    w1, b1 = make_linear(k1, d_in, d_pad, hidden_size[0], h_pad, use_bias)
    w2, b2 = make_linear(k2, hidden_size[0], h_pad, out_size, o_pad, use_bias)
    return {"w1": w1, "b1": b1, "w2": w2, "b2": b2,
            "out_size": out_size, "d_in": d_in}


# ------------------------------ reference -----------------------------------


def fcn_reference(x, params, *, last_act=None, linear=False):
    """Pure-JAX reference using the same padded params and the same precision
    policy as the kernel (low-precision MXU operands, f32 accumulation)."""
    out_size = params["out_size"]
    B, D = x.shape
    if linear and last_act is None:
        w, b = params["w"], params["b"]
        xp = jnp.zeros((B, w.shape[0]), x.dtype).at[:, :D].set(x)
        y = jnp.dot(xp.astype(w.dtype), w, preferred_element_type=jnp.float32)
        return (y + b.astype(jnp.float32))[:, :out_size]
    w1, b1, w2, b2 = params["w1"], params["b1"], params["w2"], params["b2"]
    xp = jnp.zeros((B, w1.shape[0]), x.dtype).at[:, :D].set(x)
    h = jnp.dot(xp.astype(w1.dtype), w1, preferred_element_type=jnp.float32)
    h = h + b1.astype(jnp.float32)
    h = jnp.where(h >= 0, h, 0.01 * h) if last_act is not None else jnp.maximum(h, 0.0)
    y = jnp.dot(h.astype(w2.dtype), w2, preferred_element_type=jnp.float32)
    y = y + b2.astype(jnp.float32)
    if last_act is not None:
        y = jnp.tanh(y) * jnp.float32(last_act)
    return y[:, :out_size]


# -------------------------------- demo --------------------------------------


if __name__ == "__main__":
    key = jax.random.PRNGKey(0)
    k_x, k_x2, k_p1, k_p2, k_p3 = jax.random.split(key, 5)

    # small shapes consistent with the module (flattened inputs: B x C*H*W)
    batch, channel_in, height, width = 8, 4, 4, 4
    hidden_size, out_size = (32,), 16
    d_in = channel_in * height * width

    x = jax.random.normal(k_x, (batch, d_in), jnp.float32)
    x_big = jax.random.normal(k_x2, (24, d_in), jnp.float32)  # exercises split tiling

    def check(out, ref, shape):
        assert out.dtype == jnp.float32, out.dtype
        assert out.shape == shape, out.shape
        err = float(jnp.max(jnp.abs(out - ref)))
        assert jnp.allclose(out, ref, atol=1e-3, rtol=1e-3), err

    # config 1: last_act path (Linear -> LeakyReLU -> Linear -> Tanh -> * last_act)
    p = init_fcn_params(k_p1, channel_in, height, width, hidden_size, out_size,
                        last_act=2.0)
    out = jax.block_until_ready(fcn_forward(x, p, last_act=2.0))
    check(out, fcn_reference(x, p, last_act=2.0), (batch, out_size))

    # config 2: ReLU MLP, no bias (larger batch -> two parallel batch tiles)
    p = init_fcn_params(k_p2, channel_in, height, width, hidden_size, out_size,
                        nobias=True)
    out = jax.block_until_ready(fcn_forward(x_big, p))
    check(out, fcn_reference(x_big, p), (24, out_size))

    # config 3: single linear layer
    p = init_fcn_params(k_p3, channel_in, height, width, hidden_size, out_size,
                        linear=True)
    out = jax.block_until_ready(fcn_forward(x, p, linear=True))
    check(out, fcn_reference(x, p, linear=True), (batch, out_size))

    print("KERNEL_OK")
</pallas_src>

<mosaic_0001>
module attributes {stable_mosaic.version = 11 : i64} {
  func.func @_mlp2_kernel(%arg0: i32, %arg1: i32, %arg2: memref<8x128xf32, #tpu.memory_space<vmem>>, %arg3: memref<128x128xbf16, #tpu.memory_space<vmem>>, %arg4: memref<1x128xbf16, #tpu.memory_space<vmem>>, %arg5: memref<128x128xbf16, #tpu.memory_space<vmem>>, %arg6: memref<1x128xbf16, #tpu.memory_space<vmem>>, %arg7: memref<8x128xf32, #tpu.memory_space<vmem>>, %arg8: memref<8x128xf32, #tpu.memory_space<vmem>>) attributes {dimension_semantics = [#tpu.dimension_semantics<parallel>, #tpu.dimension_semantics<arbitrary>], iteration_bounds = array<i64: 1, 1>, scalar_prefetch = 0 : i64, scratch_operands = 1 : i64, tpu.core_type = #tpu.core_type<tc>, window_params = [{transform_indices = @transform_0, window_bounds = array<i64: 8, 128>}, {transform_indices = @transform_1, window_bounds = array<i64: 128, 128>}, {pipeline_mode = #tpu.pipeline_mode<synchronous>, transform_indices = @transform_2, window_bounds = array<i64: 1, 128>}, {pipeline_mode = #tpu.pipeline_mode<synchronous>, transform_indices = @transform_3, window_bounds = array<i64: 128, 128>}, {pipeline_mode = #tpu.pipeline_mode<synchronous>, transform_indices = @transform_4, window_bounds = array<i64: 1, 128>}, {transform_indices = @transform_5, window_bounds = array<i64: 8, 128>}]} {
    %c0_i32 = arith.constant 0 : i32
    %0 = arith.cmpi eq, %arg1, %c0_i32 : i32
    %1 = arith.extui %0 : i1 to i32
    %c0_i32_0 = arith.constant 0 : i32
    %2 = arith.cmpi ne, %1, %c0_i32_0 : i32
    scf.if %2 {
      %cst_10 = arith.constant 0.000000e+00 : f32
      %13 = vector.broadcast %cst_10 : f32 to vector<8x128xf32>
      %c0_11 = arith.constant 0 : index
      %c0_12 = arith.constant 0 : index
      %14 = vector.load %arg8[%c0_11, %c0_12] : memref<8x128xf32, #tpu.memory_space<vmem>>, vector<8x128xf32>
      tpu.vector_store %arg8[%c0_11, %c0_12], %13 {strides = array<i32>} : memref<8x128xf32, #tpu.memory_space<vmem>>, vector<8x128xf32>,
    } else {
    }
    %c0 = arith.constant 0 : index
    %c0_1 = arith.constant 0 : index
    %3 = vector.load %arg8[%c0, %c0_1] : memref<8x128xf32, #tpu.memory_space<vmem>>, vector<8x128xf32>
    %c0_2 = arith.constant 0 : index
    %c0_3 = arith.constant 0 : index
    %4 = vector.load %arg2[%c0_2, %c0_3] : memref<8x128xf32, #tpu.memory_space<vmem>>, vector<8x128xf32>
    %5 = arith.truncf %4 : vector<8x128xf32> to vector<8x128xbf16>
    %c0_4 = arith.constant 0 : index
    %c0_5 = arith.constant 0 : index
    %6 = vector.load %arg3[%c0_4, %c0_5] : memref<128x128xbf16, #tpu.memory_space<vmem>>, vector<128x128xbf16>
    %cst = arith.constant dense<0.000000e+00> : vector<8x128xf32>
    %7 = tpu.matmul %5, %6, %cst {dimension_numbers = #tpu.dot_dimension_numbers<[1], [0], [0], [1], [0, 0, 1, 1], [], []>} : vector<8x128xbf16>, vector<128x128xbf16>, vector<8x128xf32> -> vector<8x128xf32>
    %8 = arith.addf %3, %7 : vector<8x128xf32>
    %c0_6 = arith.constant 0 : index
    %c0_7 = arith.constant 0 : index
    %9 = vector.load %arg8[%c0_6, %c0_7] : memref<8x128xf32, #tpu.memory_space<vmem>>, vector<8x128xf32>
    tpu.vector_store %arg8[%c0_6, %c0_7], %8 {strides = array<i32>} : memref<8x128xf32, #tpu.memory_space<vmem>>, vector<8x128xf32>,
    %c0_i32_8 = arith.constant 0 : i32
    %10 = arith.cmpi eq, %arg1, %c0_i32_8 : i32
    %11 = arith.extui %10 : i1 to i32
    %c0_i32_9 = arith.constant 0 : i32
    %12 = arith.cmpi ne, %11, %c0_i32_9 : i32
    scf.if %12 {
      %c0_10 = arith.constant 0 : index
      %c0_11 = arith.constant 0 : index
      %13 = vector.load %arg8[%c0_10, %c0_11] : memref<8x128xf32, #tpu.memory_space<vmem>>, vector<8x128xf32>
      %c0_12 = arith.constant 0 : index
      %c0_13 = arith.constant 0 : index
      %14 = vector.load %arg4[%c0_12, %c0_13] : memref<1x128xbf16, #tpu.memory_space<vmem>>, vector<1x128xbf16>
      %15 = arith.extf %14 : vector<1x128xbf16> to vector<1x128xf32>
      %16 = vector.broadcast %15 : vector<1x128xf32> to vector<8x128xf32>
      %17 = arith.addf %13, %16 : vector<8x128xf32>
      %cst_14 = arith.constant 0.000000e+00 : f32
      %18 = vector.broadcast %cst_14 : f32 to vector<8x128xf32>
      %19 = arith.cmpf oge, %17, %18 : vector<8x128xf32>
      %cst_15 = arith.constant 0.00999999977 : f32
      %20 = vector.broadcast %cst_15 : f32 to vector<8x128xf32>
      %21 = arith.mulf %20, %17 : vector<8x128xf32>
      %22 = arith.select %19, %17, %21 : vector<8x128xi1>, vector<8x128xf32>
      %23 = arith.truncf %22 : vector<8x128xf32> to vector<8x128xbf16>
      %c0_16 = arith.constant 0 : index
      %c0_17 = arith.constant 0 : index
      %24 = vector.load %arg5[%c0_16, %c0_17] : memref<128x128xbf16, #tpu.memory_space<vmem>>, vector<128x128xbf16>
      %cst_18 = arith.constant dense<0.000000e+00> : vector<8x128xf32>
      %25 = tpu.matmul %23, %24, %cst_18 {dimension_numbers = #tpu.dot_dimension_numbers<[1], [0], [0], [1], [0, 0, 1, 1], [], []>} : vector<8x128xbf16>, vector<128x128xbf16>, vector<8x128xf32> -> vector<8x128xf32>
      %c0_19 = arith.constant 0 : index
      %c0_20 = arith.constant 0 : index
      %26 = vector.load %arg6[%c0_19, %c0_20] : memref<1x128xbf16, #tpu.memory_space<vmem>>, vector<1x128xbf16>
      %27 = arith.extf %26 : vector<1x128xbf16> to vector<1x128xf32>
      %28 = vector.broadcast %27 : vector<1x128xf32> to vector<8x128xf32>
      %29 = arith.addf %25, %28 : vector<8x128xf32>
      %30 = math.tanh %29 : vector<8x128xf32>
      %cst_21 = arith.constant 2.000000e+00 : f32
      %31 = vector.broadcast %cst_21 : f32 to vector<8x128xf32>
      %32 = arith.mulf %30, %31 : vector<8x128xf32>
      %c0_22 = arith.constant 0 : index
      %c0_23 = arith.constant 0 : index
      %33 = vector.load %arg7[%c0_22, %c0_23] : memref<8x128xf32, #tpu.memory_space<vmem>>, vector<8x128xf32>
      tpu.vector_store %arg7[%c0_22, %c0_23], %32 {strides = array<i32>} : memref<8x128xf32, #tpu.memory_space<vmem>>, vector<8x128xf32>,
    } else {
    }
    return
  }
  func.func @transform_0(%arg0: i32, %arg1: i32) -> (i32, i32) {
    %c0_i32 = arith.constant 0 : i32
    return %arg0, %arg1 : i32, i32
  }
  func.func @transform_1(%arg0: i32, %arg1: i32) -> (i32, i32) {
    %c0_i32 = arith.constant 0 : i32
    %c0_i32_0 = arith.constant 0 : i32
    return %arg1, %c0_i32 : i32, i32
  }
  func.func @transform_2(%arg0: i32, %arg1: i32) -> (i32, i32) {
    %c0_i32 = arith.constant 0 : i32
    %c0_i32_0 = arith.constant 0 : i32
    %c0_i32_1 = arith.constant 0 : i32
    return %c0_i32, %c0_i32_0 : i32, i32
  }
  func.func @transform_3(%arg0: i32, %arg1: i32) -> (i32, i32) {
    %c0_i32 = arith.constant 0 : i32
    %c0_i32_0 = arith.constant 0 : i32
    %c0_i32_1 = arith.constant 0 : i32
    return %c0_i32, %c0_i32_0 : i32, i32
  }
  func.func @transform_4(%arg0: i32, %arg1: i32) -> (i32, i32) {
    %c0_i32 = arith.constant 0 : i32
    %c0_i32_0 = arith.constant 0 : i32
    %c0_i32_1 = arith.constant 0 : i32
    return %c0_i32, %c0_i32_0 : i32, i32
  }
  func.func @transform_5(%arg0: i32, %arg1: i32) -> (i32, i32) {
    %c0_i32 = arith.constant 0 : i32
    %c0_i32_0 = arith.constant 0 : i32
    return %arg0, %c0_i32 : i32, i32
  }
}

</mosaic_0001>

<bundles_post_ra>
// kernel: tpu_custom_call.1
= control target key start
LH: loop header
LB: loop body
LE: loop exit
PB: predicated region body
PF: predicated region fallthrough
CT: control target
= control target key end

     0   :  { %10 = vsyncpa [#allocation4], 0  ;;  %s611_s0 = inlined_call_operand.hbm [shape: f32[8,128], index: 0, kind: input, shape index: {}]   ;;  %s612_s1 = inlined_call_operand.hbm [shape: bf16[128,128], index: 1, kind: input, shape index: {}]   ;;  %s613_s2 = inlined_call_operand.vmem [shape: bf16[1,128], index: 2, kind: input, shape index: {}]   ;;  %s614_s3 = inlined_call_operand.hbm [shape: bf16[128,128], index: 3, kind: input, shape index: {}]   ;;  %s615_s4 = inlined_call_operand.vmem [shape: bf16[1,128], index: 4, kind: input, shape index: {}]   ;;  %s616_s5 = inlined_call_operand.hbm [shape: f32[8,128], index: 5, kind: output, shape index: {}]  }
   0x1   :  { %11 = vsyncpa [#allocation7], 0 }
   0x2   :  { %12 = vsyncpa [#allocation5], 0  ;;  %s513_s18 = smov [#allocation6]   ;;  %s419_s22 = scalar_lea.hbm %s612_s1, 1024 }
   0x3   :  { %s28_s19 = sshll.u32 %s513_s18, 4  ;;  %p420_p0 = scmp.ne.s32.totalorder %s612_s1, %s419_s22  ;;  %s29_s19 = int_to_ptr.vmem [resolvable:$true] %s28_s19 }
   0x4   :  { %p423_p1 = scmp.lt.u32.totalorder %s419_s22, %s612_s1 }
   0x6   :  { %p425_p2 = pnand %p423_p1, %p420_p0 }
   0x8   :  { %428 = shalt.err (!%p425_p2)
}
   0x9   :  { %s429_s27 = scalar_lea.vmem %s29_s19, 1024  ;;  %p434_p4 = scmp.lt.s32.totalorder %s29_s19, %s29_s19 }
   0xa   :  { %p430_p3 = scmp.ne.s32.totalorder %s29_s19, %s429_s27  ;;  %p435_p5 = scmp.lt.s32.totalorder %s429_s27, %s429_s27 }
   0xc   :  { %p436_p6 = por %p435_p5, %p434_p4 }
   0xe   :  { %p437_p7 = pnand %p436_p6, %p430_p3 }
  0x10   :  { %440 = shalt.err (!%p437_p7)
}
  0x11   :  { %s514_s28 = smov 64   ;;  %s515_s29 = smov 4  }
  0x12   :  { %34 = dma.hbm_to_vmem [thread:$0]  %s612_s1, 1024, %s29_s19, [#allocation7], %s514_s28, %s514_s28, %s515_s29  }
  0x13   :  { %s516_s7 = smov [#allocation3]   ;;  %s517_s9 = smov [#allocation8]  }
  0x14   :  { %s19_s8 = sshll.u32 %s516_s7, 4  ;;  %s42_s10 = sshll.u32 %s517_s9, 4  ;;  %s20_s8 = int_to_ptr.vmem [resolvable:$true] %s19_s8  ;;  %s43_s10 = int_to_ptr.vmem [resolvable:$true] %s42_s10 }
  0x15   :  { %s441_s13 = scalar_lea.hbm %s611_s0, 128 }
  0x16   :  { %p442_p8 = scmp.ne.s32.totalorder %s611_s0, %s441_s13  ;;  %p445_p9 = scmp.lt.u32.totalorder %s441_s13, %s611_s0 }
  0x18   :  { %p447_p10 = pnand %p445_p9, %p442_p8 }
  0x1a   :  { %450 = shalt.err (!%p447_p10)
}
  0x1b   :  { %s451_s1 = scalar_lea.vmem %s20_s8, 128  ;;  %p456_p12 = scmp.lt.s32.totalorder %s20_s8, %s20_s8 }
  0x1c   :  { %p452_p11 = scmp.ne.s32.totalorder %s20_s8, %s451_s1  ;;  %p457_p13 = scmp.lt.s32.totalorder %s451_s1, %s451_s1 }
  0x1e   :  { %p458_p0 = por %p457_p13, %p456_p12 }
  0x20   :  { %p459_p1 = pnand %p458_p0, %p452_p11 }
  0x22   :  { %462 = shalt.err (!%p459_p1)
}
  0x23   :  { %22 = dma.hbm_to_vmem [thread:$0]  %s611_s0, 128, %s20_s8, [#allocation4]  }
  0x24   :  { %s463_s22 = scalar_lea.hbm %s614_s3, 1024 }
  0x25   :  { %p464_p2 = scmp.ne.s32.totalorder %s614_s3, %s463_s22  ;;  %p467_p3 = scmp.lt.u32.totalorder %s463_s22, %s614_s3 }
  0x27   :  { %p469_p4 = pnand %p467_p3, %p464_p2 }
  0x29   :  { %472 = shalt.err (!%p469_p4)
}
  0x2a   :  { %s473_s27 = scalar_lea.vmem %s43_s10, 1024  ;;  %p478_p6 = scmp.lt.s32.totalorder %s43_s10, %s43_s10 }
  0x2b   :  { %p474_p5 = scmp.ne.s32.totalorder %s43_s10, %s473_s27  ;;  %p479_p7 = scmp.lt.s32.totalorder %s473_s27, %s473_s27 }
  0x2d   :  { %p480_p8 = por %p479_p7, %p478_p6 }
  0x2f   :  { %p481_p9 = pnand %p480_p8, %p474_p5 }
  0x31   :  { %484 = shalt.err (!%p481_p9)
}
  0x32   :  { %48 = dma.hbm_to_vmem [thread:$0]  %s614_s3, 1024, %s43_s10, [#allocation7], %s514_s28, %s514_s28, %s515_s29  }
  0x33   :  { %507 = dma.done.wait [#allocation4], 128  }
  0x34   :  { %508 = vsyncadd [#allocation4], 4294967168 }
  0x35   :  { %509 = dma.done.wait [#allocation7], 2048  }
  0x36   :  { %510 = vsyncadd [#allocation7], 4294965248  ;;  %v518_v0 = vmov 0.0   ;;  %vm519_vm0 = vmmov 0   ;;  %v401_v1 = vld [vmem:[#allocation6] sm:$0xff]   ;;  %v402_v2 = vld [vmem:[#allocation6 + $0x8] sm:$0xff]   ;;  %v181_v19 = vlaneseq }
  0x37   :  { %353 = vmatprep.subr.bf16.mxu0 %v518_v0  ;;  %369 = vmatprep.mubr.msk.bf16.mxu0 %vm519_vm0, %v518_v0  ;;  %v403_v3 = vld [vmem:[#allocation6 + $0x10] sm:$0xff]   ;;  %v409_v4 = vld [vmem:[#allocation8] sm:$0xff]   ;;  %v404_v5 = vld [vmem:[#allocation6 + $0x18] sm:$0xff]  }
  0x38   :  { %373 = vmatprep.subr.bf16.mxu1 %v518_v0  ;;  %389 = vmatprep.mubr.msk.bf16.mxu1 %vm519_vm0, %v518_v0  ;;  %v410_v6 = vld [vmem:[#allocation8 + $0x8] sm:$0xff]   ;;  %v405_v7 = vld [vmem:[#allocation6 + $0x20] sm:$0xff]   ;;  %v411_v8 = vld [vmem:[#allocation8 + $0x10] sm:$0xff]   ;;  %v182_v20 = vshrl.u32 %v181_v19, 7 }
  0x39   :  { %354 = vmatpush3.bf16.msra.mxu0 %v401_v1  ;;  %374 = vmatpush3.bf16.msra.mxu1 %v409_v4  ;;  %v406_v9 = vld [vmem:[#allocation6 + $0x28] sm:$0xff]   ;;  %v412_v10 = vld [vmem:[#allocation8 + $0x18] sm:$0xff]   ;;  %v407_v11 = vld [vmem:[#allocation6 + $0x30] sm:$0xff]  }
  0x3a   :  { %355 = vmatprep.subr.bf16.mxu0 %v518_v0  ;;  %375 = vmatprep.subr.bf16.mxu1 %v518_v0  ;;  %v413_v12 = vld [vmem:[#allocation8 + $0x20] sm:$0xff]   ;;  %v408_v13 = vld [vmem:[#allocation6 + $0x38] sm:$0xff]   ;;  %v414_v15 = vld [vmem:[#allocation8 + $0x28] sm:$0xff]   ;;  %v183_v23 = vsub.s32 0, %v182_v20 }
  0x3b   :  { %v67_v14 = vld [vmem:[#allocation3] sm:$0xff]  ;;  %v415_v17 = vld [vmem:[#allocation8 + $0x30] sm:$0xff]  }
  0x3c   :  { %v68_v16 = vpack.c.bf16 %v67_v14, %v67_v14  ;;  %v416_v18 = vld [vmem:[#allocation8 + $0x38] sm:$0xff]  }
  0x3d   :  { %356 = vmatpush3.bf16.msra.mxu0 %v402_v2  ;;  %376 = vmatpush3.bf16.msra.mxu1 %v410_v6  ;;  %v179_v21 = vld [vmem:[%s613_s2] sm:$0x1]  ;;  %s520_s2 = smov [#allocation9]  }
  0x3e   :  { %357 = vmatprep.subr.bf16.mxu0 %v518_v0  ;;  %377 = vmatprep.subr.bf16.mxu1 %v518_v0  ;;  %v180_v22 = vunpack.c.l.bf16 %v179_v21  ;;  %v206_v33 = vld [vmem:[%s615_s4] sm:$0x1]  ;;  %s309_s7 = sshll.u32 %s520_s2, 4  ;;  %s310_s7 = int_to_ptr.vmem [resolvable:$true] %s309_s7 }
  0x3f   :  { %v207_v34 = vunpack.c.l.bf16 %v206_v33  ;;  %s485_s8 = scalar_lea.vmem %s310_s7, 128  ;;  %p490_p11 = scmp.lt.s32.totalorder %s310_s7, %s310_s7 }
  0x40   :  { %v184_v24 = vrot.slane %v180_v22, %v183_v23  ;;  %p486_p10 = scmp.ne.s32.totalorder %s310_s7, %s485_s8  ;;  %p491_p12 = scmp.lt.s32.totalorder %s485_s8, %s485_s8 }
  0x41   :  { %358 = vmatpush3.bf16.msra.mxu0 %v403_v3  ;;  %378 = vmatpush3.bf16.msra.mxu1 %v411_v8  ;;  %v211_v35 = vrot.slane %v207_v34, %v183_v23 }
  0x42   :  { %359 = vmatprep.subr.bf16.mxu0 %v518_v0  ;;  %379 = vmatprep.subr.bf16.mxu1 %v518_v0  ;;  %p492_p13 = por %p491_p12, %p490_p11 }
  0x44   :  { %p493_p0 = pnand %p492_p13, %p486_p10 }
  0x45   :  { %360 = vmatpush3.bf16.msra.mxu0 %v404_v5  ;;  %380 = vmatpush3.bf16.msra.mxu1 %v412_v10 }
  0x46   :  { %361 = vmatprep.subr.bf16.mxu0 %v518_v0  ;;  %381 = vmatprep.subr.bf16.mxu1 %v518_v0 }
  0x49   :  { %362 = vmatpush3.bf16.msra.mxu0 %v405_v7  ;;  %382 = vmatpush3.bf16.msra.mxu1 %v413_v12 }
  0x4a   :  { %363 = vmatprep.subr.bf16.mxu0 %v518_v0  ;;  %383 = vmatprep.subr.bf16.mxu1 %v518_v0 }
  0x4d   :  { %364 = vmatpush3.bf16.msra.mxu0 %v406_v9  ;;  %384 = vmatpush3.bf16.msra.mxu1 %v414_v15 }
  0x4e   :  { %365 = vmatprep.subr.bf16.mxu0 %v518_v0  ;;  %385 = vmatprep.subr.bf16.mxu1 %v518_v0 }
  0x51   :  { %366 = vmatpush3.bf16.msra.mxu0 %v407_v11  ;;  %386 = vmatpush3.bf16.msra.mxu1 %v415_v17 }
  0x52   :  { %367 = vmatprep.subr.bf16.mxu0 %v518_v0  ;;  %387 = vmatprep.subr.bf16.mxu1 %v518_v0 }
  0x55   :  { %368 = vmatpush3.bf16.msra.mxu0 %v408_v13  ;;  %388 = vmatpush3.bf16.msra.mxu1 %v416_v18 }
  0x58   :  { %370 = vmatmul.mubr.bf16.vlgmr.msra.gmra.mrb[0].mxu0 %v68_v16 }
 0x12b   :  { %v167_v25 = vpop.f32.mrb[0].mxu0 }
 0x12c   :  { %v185_v26 = vadd.f32 %v184_v24, %v167_v25  ;;  %v371_v27 = vpop.f32.mrb[1].mxu0 }
 0x12d   :  { %v170_v28 = vpop.f32.mrb[2].mxu0 }
 0x12e   :  { %vm186_vm1 = vcmp.ge.f32.partialorder %v185_v26, 0.0  ;;  %v187_v29 = vmul.f32 0.01, %v185_v26  ;;  %v372_v30 = vpop.f32.mrb[3].mxu0 }
 0x130   :  { %v188_v31 = vsel %vm186_vm1, %v185_v26, %v187_v29 }
 0x131   :  { %v189_v32 = vpack.c.bf16 %v188_v31, %v188_v31 }
 0x133   :  { %390 = vmatmul.mubr.bf16.vlgmr.msra.gmra.mrb[0].mxu1 %v189_v32 }
 0x206   :  { %v294_v36 = vpop.f32.mrb[0].mxu1 }
 0x207   :  { %v295_v37 = vadd.f32 %v294_v36, %v211_v35  ;;  %v391_v38 = vpop.f32.mrb[1].mxu1 }
 0x208   :  { %v297_v39 = vpop.f32.mrb[2].mxu1 }
 0x209   :  { %417 = vtanh.f32 %v295_v37  ;;  %v392_v40 = vpop.f32.mrb[3].mxu1 }
 0x213   :  { %v418_v41 = vpop.eup %417 }
 0x214   :  { %v301_v42 = vmul.f32 2.0, %v418_v41 }
 0x216   :  { %302 = vst [vmem:[#allocation9] sm:$0xff] %v301_v42 }
 0x217   :  { %496 = shalt.err (!%p493_p0)
}
 0x218   :  { %s497_s10 = scalar_lea.hbm %s616_s5, 128 }
 0x219   :  { %p498_p1 = scmp.ne.s32.totalorder %s616_s5, %s497_s10  ;;  %p501_p2 = scmp.lt.u32.totalorder %s497_s10, %s616_s5 }
 0x21b   :  { %p503_p3 = pnand %p501_p2, %p498_p1 }
 0x21d   :  { %506 = shalt.err (!%p503_p3)
}
 0x21e   :  { %312 = dma.vmem_to_hbm [thread:$0]  %s310_s7, 128, %s616_s5, [#allocation5]  }
 0x21f   :  { %511 = dma.done.wait [#allocation5], 128  }
 0x220   :  { %512 = vsyncadd [#allocation5], 4294967168 }
 0x221   :  { %316 = vsyncpa [#allocation4], 1 }
 0x222   :  { %317 = vsyncpa [#allocation7], 1 }
 0x223   :  { %318 = vsyncpa [#allocation5], 1 }

</bundles_post_ra>
